<compile_context>
chip_gen: v7x
topology: tpu7x:2x2x1
jax: 0.10.0
libtpu: 0.0.40
codegen_flags: <defaults>
</compile_context>

<pallas_src>
import functools

import jax
import jax.numpy as jnp
from jax.experimental import pallas as pl
from jax.experimental.pallas import tpu as pltpu


def _mlp_kernel(x_ref, w1_ref, t1_ref, w2_ref, t2_ref, w3_ref, b3_ref, o_ref):
    x = x_ref[...]                                                    # (TB, D)

    # fc1 + folded bn1 -> relu  (Linear bias and BN affine folded into w1/t1)
    h1 = jnp.maximum(
        jnp.dot(x, w1_ref[...], preferred_element_type=jnp.float32) + t1_ref[...],
        0.0)                                                          # (TB, H)

    # dropout: identity in eval mode

    # fc2 + folded bn2 -> relu
    h2 = jnp.maximum(
        jnp.dot(h1, w2_ref[...], preferred_element_type=jnp.float32) + t2_ref[...],
        0.0)                                                          # (TB, H2)

    # fc3 with N=1: VPU multiply + lane (XLU) reduction instead of an MXU pass
    logits = jnp.sum(h2 * w3_ref[...], axis=-1, keepdims=True) + b3_ref[...]
    o_ref[...] = jax.nn.sigmoid(logits)                               # (TB, 1)


def prepare_params(params, eps=1e-5):
    """One-time fold of BatchNorm running stats + Linear biases into the
    matmul weights / per-feature shifts. Call once, outside the hot path."""
    s1 = params["bn1_gamma"] / jnp.sqrt(params["bn1_var"] + eps)            # (H,)
    t1 = params["bn1_beta"] + (params["fc1_b"] - params["bn1_mean"]) * s1   # (H,)
    w1 = params["fc1_w"].T * s1[None, :]                                    # (D, H)

    s2 = params["bn2_gamma"] / jnp.sqrt(params["bn2_var"] + eps)            # (H2,)
    t2 = params["bn2_beta"] + (params["fc2_b"] - params["bn2_mean"]) * s2   # (H2,)
    w2 = params["fc2_w"].T * s2[None, :]                                    # (H, H2)

    return {
        "w1": jnp.asarray(w1, jnp.float32),
        "t1": jnp.asarray(t1, jnp.float32)[None, :],          # (1, H)
        "w2": jnp.asarray(w2, jnp.float32),
        "t2": jnp.asarray(t2, jnp.float32)[None, :],          # (1, H2)
        "w3": jnp.asarray(params["fc3_w"], jnp.float32),      # (1, H2) row
        "b3": jnp.asarray(params["fc3_b"], jnp.float32)[None, :],  # (1, 1)
    }


@functools.partial(jax.jit, static_argnames=("block_b",))
def biometric_mlp_forward(x, folded, block_b=512):
    """Eval-mode forward pass over pre-folded params (see prepare_params)."""
    B, D = x.shape
    H = folded["w1"].shape[1]
    H2 = folded["w2"].shape[1]

    # Batch tile: multiple of 8 sublanes, capped at block_b; pad B so every
    # tile is full (padding rows only feed extra sigmoid rows that we drop).
    tb = min(block_b, max(8, ((B + 7) // 8) * 8))
    padded_b = ((B + tb - 1) // tb) * tb
    if padded_b != B:
        x = jnp.pad(x, ((0, padded_b - B), (0, 0)))

    const = lambda i: (0, 0)   # weights/shifts stay resident across the grid

    out = pl.pallas_call(
        _mlp_kernel,
        out_shape=jax.ShapeDtypeStruct((padded_b, 1), jnp.float32),
        grid=(padded_b // tb,),
        in_specs=[
            pl.BlockSpec((tb, D), lambda i: (i, 0)),   # x: streamed per batch tile
            pl.BlockSpec((D, H), const),               # w1'
            pl.BlockSpec((1, H), const),               # t1'
            pl.BlockSpec((H, H2), const),              # w2'
            pl.BlockSpec((1, H2), const),              # t2'
            pl.BlockSpec((1, H2), const),              # w3 row
            pl.BlockSpec((1, 1), const),               # b3
        ],
        out_specs=pl.BlockSpec((tb, 1), lambda i: (i, 0)),
        compiler_params=pltpu.CompilerParams(
            dimension_semantics=("parallel",)),
    )(x, folded["w1"], folded["t1"], folded["w2"], folded["t2"],
      folded["w3"], folded["b3"])

    return out[:B]


def _reference_forward(x, params, eps=1e-5):
    """Pure-JAX reference mirroring PyTorch eval-mode semantics."""
    h = x @ params["fc1_w"].T + params["fc1_b"]
    h = (h - params["bn1_mean"]) / jnp.sqrt(params["bn1_var"] + eps)
    h = h * params["bn1_gamma"] + params["bn1_beta"]
    h = jnp.maximum(h, 0.0)
    h = h @ params["fc2_w"].T + params["fc2_b"]
    h = (h - params["bn2_mean"]) / jnp.sqrt(params["bn2_var"] + eps)
    h = h * params["bn2_gamma"] + params["bn2_beta"]
    h = jnp.maximum(h, 0.0)
    h = h @ params["fc3_w"].T + params["fc3_b"]
    return jax.nn.sigmoid(h)


def make_params(key, input_dim, hidden_dim):
    h2 = hidden_dim // 2
    ks = jax.random.split(key, 12)
    f32 = jnp.float32
    return {
        "fc1_w": jax.random.normal(ks[0], (hidden_dim, input_dim), f32) * 0.1,
        "fc1_b": jax.random.normal(ks[1], (hidden_dim,), f32) * 0.1,
        "bn1_gamma": 1.0 + 0.1 * jax.random.normal(ks[2], (hidden_dim,), f32),
        "bn1_beta": 0.1 * jax.random.normal(ks[3], (hidden_dim,), f32),
        "bn1_mean": 0.05 * jax.random.normal(ks[4], (hidden_dim,), f32),
        "bn1_var": 1.0 + 0.1 * jax.nn.softplus(jax.random.normal(ks[5], (hidden_dim,), f32)),
        "fc2_w": jax.random.normal(ks[6], (h2, hidden_dim), f32) * 0.1,
        "fc2_b": jax.random.normal(ks[7], (h2,), f32) * 0.1,
        "bn2_gamma": 1.0 + 0.1 * jax.random.normal(ks[8], (h2,), f32),
        "bn2_beta": 0.1 * jax.random.normal(ks[9], (h2,), f32),
        "bn2_mean": 0.05 * jax.random.normal(ks[10], (h2,), f32),
        "bn2_var": 1.0 + 0.1 * jax.nn.softplus(jax.random.normal(ks[11], (h2,), f32)),
        "fc3_w": jax.random.normal(jax.random.fold_in(key, 99), (1, h2), f32) * 0.1,
        "fc3_b": jnp.array([0.05], f32),
    }


if __name__ == "__main__":
    key = jax.random.PRNGKey(0)
    batch, input_dim, hidden_dim = 8, 16, 32

    kx, kp = jax.random.split(key)
    x = jax.random.normal(kx, (batch, input_dim), jnp.float32)
    params = make_params(kp, input_dim, hidden_dim)

    # One-time parameter folding (not part of the per-call hot path).
    folded = prepare_params(params)

    out = biometric_mlp_forward(x, folded)
    out = jax.block_until_ready(out)

    ref = _reference_forward(x, params)
    assert out.shape == (batch, 1)
    assert jnp.allclose(out, ref, atol=1e-5, rtol=1e-5), (out, ref)

    # Also exercise a multi-tile batch (padded + gridded path).
    xb = jax.random.normal(jax.random.fold_in(key, 7), (1000, input_dim), jnp.float32)
    outb = jax.block_until_ready(biometric_mlp_forward(xb, folded))
    refb = _reference_forward(xb, params)
    assert outb.shape == (1000, 1)
    assert jnp.allclose(outb, refb, atol=1e-5, rtol=1e-5)

    print("KERNEL_OK")
</pallas_src>

<mosaic_0001>
module attributes {stable_mosaic.version = 11 : i64} {
  func.func @_mlp_kernel(%arg0: i32, %arg1: memref<8x16xf32, #tpu.memory_space<vmem>>, %arg2: memref<16x32xf32, #tpu.memory_space<vmem>>, %arg3: memref<1x32xf32, #tpu.memory_space<vmem>>, %arg4: memref<32x16xf32, #tpu.memory_space<vmem>>, %arg5: memref<1x16xf32, #tpu.memory_space<vmem>>, %arg6: memref<1x16xf32, #tpu.memory_space<vmem>>, %arg7: memref<1x1xf32, #tpu.memory_space<vmem>>, %arg8: memref<8x1xf32, #tpu.memory_space<vmem>>) attributes {dimension_semantics = [#tpu.dimension_semantics<parallel>], iteration_bounds = array<i64: 1>, scalar_prefetch = 0 : i64, scratch_operands = 0 : i64, tpu.core_type = #tpu.core_type<tc>, window_params = [{transform_indices = @transform_0, window_bounds = array<i64: 8, 16>}, {pipeline_mode = #tpu.pipeline_mode<synchronous>, transform_indices = @transform_1, window_bounds = array<i64: 16, 32>}, {pipeline_mode = #tpu.pipeline_mode<synchronous>, transform_indices = @transform_2, window_bounds = array<i64: 1, 32>}, {pipeline_mode = #tpu.pipeline_mode<synchronous>, transform_indices = @transform_3, window_bounds = array<i64: 32, 16>}, {pipeline_mode = #tpu.pipeline_mode<synchronous>, transform_indices = @transform_4, window_bounds = array<i64: 1, 16>}, {pipeline_mode = #tpu.pipeline_mode<synchronous>, transform_indices = @transform_5, window_bounds = array<i64: 1, 16>}, {pipeline_mode = #tpu.pipeline_mode<synchronous>, transform_indices = @transform_6, window_bounds = array<i64: 1, 1>}, {transform_indices = @transform_7, window_bounds = array<i64: 8, 1>}]} {
    %c0 = arith.constant 0 : index
    %c0_0 = arith.constant 0 : index
    %0 = vector.load %arg1[%c0, %c0_0] : memref<8x16xf32, #tpu.memory_space<vmem>>, vector<8x16xf32>
    %c0_1 = arith.constant 0 : index
    %c0_2 = arith.constant 0 : index
    %1 = vector.load %arg2[%c0_1, %c0_2] : memref<16x32xf32, #tpu.memory_space<vmem>>, vector<16x32xf32>
    %cst = arith.constant dense<0.000000e+00> : vector<8x32xf32>
    %2 = tpu.matmul %0, %1, %cst {dimension_numbers = #tpu.dot_dimension_numbers<[1], [0], [0], [1], [0, 0, 1, 1], [], []>} : vector<8x16xf32>, vector<16x32xf32>, vector<8x32xf32> -> vector<8x32xf32>
    %c0_3 = arith.constant 0 : index
    %c0_4 = arith.constant 0 : index
    %3 = vector.load %arg3[%c0_3, %c0_4] : memref<1x32xf32, #tpu.memory_space<vmem>>, vector<1x32xf32>
    %4 = vector.broadcast %3 : vector<1x32xf32> to vector<8x32xf32>
    %5 = arith.addf %2, %4 : vector<8x32xf32>
    %cst_5 = arith.constant 0.000000e+00 : f32
    %6 = vector.broadcast %cst_5 : f32 to vector<8x32xf32>
    %7 = arith.maximumf %5, %6 : vector<8x32xf32>
    %c0_6 = arith.constant 0 : index
    %c0_7 = arith.constant 0 : index
    %8 = vector.load %arg4[%c0_6, %c0_7] : memref<32x16xf32, #tpu.memory_space<vmem>>, vector<32x16xf32>
    %cst_8 = arith.constant dense<0.000000e+00> : vector<8x16xf32>
    %9 = tpu.matmul %7, %8, %cst_8 {dimension_numbers = #tpu.dot_dimension_numbers<[1], [0], [0], [1], [0, 0, 1, 1], [], []>} : vector<8x32xf32>, vector<32x16xf32>, vector<8x16xf32> -> vector<8x16xf32>
    %c0_9 = arith.constant 0 : index
    %c0_10 = arith.constant 0 : index
    %10 = vector.load %arg5[%c0_9, %c0_10] : memref<1x16xf32, #tpu.memory_space<vmem>>, vector<1x16xf32>
    %11 = vector.broadcast %10 : vector<1x16xf32> to vector<8x16xf32>
    %12 = arith.addf %9, %11 : vector<8x16xf32>
    %cst_11 = arith.constant 0.000000e+00 : f32
    %13 = vector.broadcast %cst_11 : f32 to vector<8x16xf32>
    %14 = arith.maximumf %12, %13 : vector<8x16xf32>
    %c0_12 = arith.constant 0 : index
    %c0_13 = arith.constant 0 : index
    %15 = vector.load %arg6[%c0_12, %c0_13] : memref<1x16xf32, #tpu.memory_space<vmem>>, vector<1x16xf32>
    %16 = vector.broadcast %15 : vector<1x16xf32> to vector<8x16xf32>
    %17 = arith.mulf %14, %16 : vector<8x16xf32>
    %cst_14 = arith.constant dense<0.000000e+00> : vector<8xf32>
    %18 = vector.multi_reduction <add>, %17, %cst_14 [1] : vector<8x16xf32> to vector<8xf32>
    %19 = vector.shape_cast %18 : vector<8xf32> to vector<8x1xf32>
    %c0_15 = arith.constant 0 : index
    %c0_16 = arith.constant 0 : index
    %20 = vector.load %arg7[%c0_15, %c0_16] : memref<1x1xf32, #tpu.memory_space<vmem>>, vector<1x1xf32>
    %21 = vector.broadcast %20 : vector<1x1xf32> to vector<8x1xf32>
    %22 = arith.addf %19, %21 : vector<8x1xf32>
    %23 = arith.negf %22 : vector<8x1xf32>
    %24 = math.exp %23 : vector<8x1xf32>
    %cst_17 = arith.constant 1.000000e+00 : f32
    %25 = vector.broadcast %cst_17 : f32 to vector<8x1xf32>
    %26 = arith.addf %25, %24 : vector<8x1xf32>
    %27 = arith.divf %25, %26 : vector<8x1xf32>
    %c0_18 = arith.constant 0 : index
    %c0_19 = arith.constant 0 : index
    %28 = vector.load %arg8[%c0_18, %c0_19] : memref<8x1xf32, #tpu.memory_space<vmem>>, vector<8x1xf32>
    tpu.vector_store %arg8[%c0_18, %c0_19], %27 {strides = array<i32>} : memref<8x1xf32, #tpu.memory_space<vmem>>, vector<8x1xf32>,
    return
  }
  func.func @transform_0(%arg0: i32) -> (i32, i32) {
    %c0_i32 = arith.constant 0 : i32
    %c0_i32_0 = arith.constant 0 : i32
    return %arg0, %c0_i32 : i32, i32
  }
  func.func @transform_1(%arg0: i32) -> (i32, i32) {
    %c0_i32 = arith.constant 0 : i32
    %c0_i32_0 = arith.constant 0 : i32
    %c0_i32_1 = arith.constant 0 : i32
    return %c0_i32, %c0_i32_0 : i32, i32
  }
  func.func @transform_2(%arg0: i32) -> (i32, i32) {
    %c0_i32 = arith.constant 0 : i32
    %c0_i32_0 = arith.constant 0 : i32
    %c0_i32_1 = arith.constant 0 : i32
    return %c0_i32, %c0_i32_0 : i32, i32
  }
  func.func @transform_3(%arg0: i32) -> (i32, i32) {
    %c0_i32 = arith.constant 0 : i32
    %c0_i32_0 = arith.constant 0 : i32
    %c0_i32_1 = arith.constant 0 : i32
    return %c0_i32, %c0_i32_0 : i32, i32
  }
  func.func @transform_4(%arg0: i32) -> (i32, i32) {
    %c0_i32 = arith.constant 0 : i32
    %c0_i32_0 = arith.constant 0 : i32
    %c0_i32_1 = arith.constant 0 : i32
    return %c0_i32, %c0_i32_0 : i32, i32
  }
  func.func @transform_5(%arg0: i32) -> (i32, i32) {
    %c0_i32 = arith.constant 0 : i32
    %c0_i32_0 = arith.constant 0 : i32
    %c0_i32_1 = arith.constant 0 : i32
    return %c0_i32, %c0_i32_0 : i32, i32
  }
  func.func @transform_6(%arg0: i32) -> (i32, i32) {
    %c0_i32 = arith.constant 0 : i32
    %c0_i32_0 = arith.constant 0 : i32
    %c0_i32_1 = arith.constant 0 : i32
    return %c0_i32, %c0_i32_0 : i32, i32
  }
  func.func @transform_7(%arg0: i32) -> (i32, i32) {
    %c0_i32 = arith.constant 0 : i32
    %c0_i32_0 = arith.constant 0 : i32
    return %arg0, %c0_i32 : i32, i32
  }
}

</mosaic_0001>

<bundles_post_ra>
// kernel: biometric_mlp_forward.1
= control target key start
LH: loop header
LB: loop body
LE: loop exit
PB: predicated region body
PF: predicated region fallthrough
CT: control target
= control target key end

     0   :  { %v279_v0 = vmov 0.0|0.0   ;;  %vm280_vm0 = vmmov 0   ;;  %v281_v3 = vmov 0.0   ;;  %vm38_vm1 = vcmask 130048   ;;  %s360_s1 = inlined_call_operand.vmem [shape: f32[16,32], index: 1, kind: input, shape index: {}]   ;;  %s361_s3 = inlined_call_operand.vmem [shape: f32[32,16], index: 3, kind: input, shape index: {}]   ;;  %s362_s0 = inlined_call_operand.vmem [shape: f32[8,16], index: 0, kind: input, shape index: {}]   ;;  %s363_s2 = inlined_call_operand.vmem [shape: f32[1,32], index: 2, kind: input, shape index: {}]   ;;  %s364_s6 = inlined_call_operand.<no memory space> [shape: f32[1,1], index: 6, kind: input, shape index: {}]   ;;  %s365_s4 = inlined_call_operand.vmem [shape: f32[1,16], index: 4, kind: input, shape index: {}]   ;;  %s366_s5 = inlined_call_operand.vmem [shape: f32[1,16], index: 5, kind: input, shape index: {}]   ;;  %s367_s7 = inlined_call_operand.vmem [shape: f32[8,1], index: 7, kind: output, shape index: {}]  }
   0x1   :  { %263 = vmatprep.subr.bf16.mxu0 %v279_v0  ;;  %v29_v1 = vld [vmem:[%s360_s1] sm:$0xff]  ;;  %v30_v2 = vld [vmem:[%s360_s1 + $0x8] sm:$0xff]  ;;  %249 = vmatprep.mubr.msk.f32.mxu0 %vm280_vm0, %v281_v3  ;;  %v115_v9 = vld [vmem:[%s361_s3 + $0x10] sm:$0xff]  ;;  %vm124_vm2 = vcmask 261120   ;;  %v12_v17 = vstv %s364_s6  ;;  %vm224_vm3 = vcmask 7168  }
   0x2   :  { %v264_v4 = vpack.c.bf16 %v30_v2, %v29_v1  ;;  %266 = vmatprep.subr.bf16.mxu1 %v279_v0  ;;  %v113_v5 = vld [vmem:[%s361_s3] sm:$0xff]  ;;  %v114_v6 = vld [vmem:[%s361_s3 + $0x8] sm:$0xff]  ;;  %260 = vmatprep.mubr.msk.f32.mxu1 %vm280_vm0, %v281_v3  ;;  %v116_v10 = vld [vmem:[%s361_s3 + $0x18] sm:$0xff]  ;;  %13 = vst [vmem:[#allocation2] sm:$0x1] %v12_v17 }
   0x3   :  { %v267_v7 = vpack.c.bf16 %v114_v6, %v113_v5  ;;  %v28_v8 = vld [vmem:[%s362_s0] sm:$0xff]  ;;  %v270_v11 = vpack.c.bf16 %v116_v10, %v115_v9 }
   0x4   :  { %265 = vmatpush3.bf16.msra.mxu0 %v264_v4  ;;  %v230_v12 = vld [vmem:[%s363_s2] ss:$0 sm:$0xff] }
   0x5   :  { %268 = vmatpush3.bf16.msra.mxu1 %v267_v7  ;;  %v232_v18 = vld [vmem:[%s365_s4] ss:$0 sm:$0xff] }
   0x6   :  { %269 = vmatprep.subr.bf16.mxu1 %v279_v0  ;;  %v234_v22 = vld [vmem:[%s366_s5] ss:$0 sm:$0xff] }
   0x7   :  { %250 = vmatmul.mubr.msk.f32.vlgmr.msra.gmra.mrb[0].mxu0 %vm38_vm1, %v28_v8 }
   0x9   :  { %271 = vmatpush3.bf16.msra.mxu1 %v270_v11  ;;  %v235_v26 = vld [vmem:[#allocation2] ss:$0 sm:$0xff] }
  0xda   :  { %v108_v13 = vpop.f32.mrb[0].mxu0 }
  0xdb   :  { %v109_v14 = vadd.f32 %v230_v12, %v108_v13  ;;  %v251_v15 = vpop.f32.mrb[1].mxu0 }
  0xdd   :  { %v112_v16 = vmax.f32 %v109_v14, 0.0 }
  0xdf   :  { %261 = vmatmul.mubr.msk.f32.vlgmr.msra.gmra.mrb[0].mxu1 %vm124_vm2, %v112_v16 }
 0x1b2   :  { %v194_v19 = vpop.f32.mrb[0].mxu1 }
 0x1b3   :  { %v195_v20 = vadd.f32 %v232_v18, %v194_v19  ;;  %v262_v21 = vpop.f32.mrb[1].mxu1 }
 0x1b5   :  { %v198_v23 = vmax.f32 %v195_v20, 0.0 }
 0x1b7   :  { %v206_v24 = vmul.f32 %v234_v22, %v198_v23 }
 0x1b9   :  { %v207_v25 = vsel %vm38_vm1, %v206_v24, 0.0 }
 0x1ba   :  { %208 = vadd.xlane.f32.xlu0 %v207_v25 }
 0x247   :  { %v209_v27 = vpop.xlane.xlu0 %208 }
 0x248   :  { %v217_v28 = vadd.f32 %v235_v26, %v209_v27 }
 0x24a   :  { %v236_v29 = vmul.f32 -1.442695, %v217_v28 }
 0x24c   :  { %275 = vpow2.f32 %v236_v29 }
 0x256   :  { %v276_v30 = vpop.eup %275 }
 0x257   :  { %v221_v31 = vadd.f32 1.0, %v276_v30 }
 0x259   :  { %277 = vrcp.f32 %v221_v31 }
 0x263   :  { %v278_v32 = vpop.eup %277 }
 0x264   :  { %225 = vst.msk [vmem:[%s367_s7] sm:$0xff] %vm224_vm3, %v278_v32 }

</bundles_post_ra>
